<compile_context>
chip_gen: v6e
topology: v6e:2x2x1
jax: 0.10.0
libtpu: 0.0.40
codegen_flags: <defaults>
</compile_context>

<pallas_src>
import functools

import jax
import jax.numpy as jnp
from jax.experimental import pallas as pl
from jax.experimental.pallas import tpu as pltpu


# ---------------------------------------------------------------------------
# Kernel 1: conv (im2col matmul) + bias + ReLU + fused global average pool.
#
# grid = (Cfeat/TN, N, HW/T_HW)
#   axis 0 ("parallel")  : output-channel tiles   -> sharded across TensorCores
#   axis 1 ("arbitrary") : image index            -> selects accumulator row
#   axis 2 ("arbitrary") : spatial tiles (last)   -> pool reduction axis
# ---------------------------------------------------------------------------
def conv_relu_pool_kernel(patch_ref, w_ref, b_ref, o_ref, acc_ref, *, inv_hw):
    n = pl.program_id(1)
    hw = pl.program_id(2)

    @pl.when(jnp.logical_and(n == 0, hw == 0))
    def _():
        acc_ref[...] = jnp.zeros_like(acc_ref)

    # (T_HW, K) @ (K, TN) on the MXU, bf16 inputs, f32 accumulation.
    y = jnp.dot(patch_ref[0], w_ref[...], preferred_element_type=jnp.float32)
    y = jnp.maximum(y + b_ref[...], 0.0)

    # Accumulate this tile's spatial sum into the pooled row of image `n`.
    # One-hot row mask avoids a dynamic sublane store into the scratch.
    rowsum = jnp.sum(y, axis=0, keepdims=True)                      # (1, TN)
    row_ids = jax.lax.broadcasted_iota(jnp.int32, acc_ref.shape, 0)  # (N_PAD, TN)
    acc_ref[...] = acc_ref[...] + jnp.where(row_ids == n, rowsum, 0.0)

    @pl.when(jnp.logical_and(n == pl.num_programs(1) - 1,
                             hw == pl.num_programs(2) - 1))
    def _():
        o_ref[...] = acc_ref[...] * inv_hw


# ---------------------------------------------------------------------------
# Kernel 2: fc1 + BatchNorm1d (training-mode batch statistics, eps=1e-5).
# Tiny (N rows) -> single block; output padded lane-dense (E_pad % 128 == 0).
# ---------------------------------------------------------------------------
def fc_bn_kernel(pooled_ref, w_ref, b_ref, gamma_ref, beta_ref, o_ref):
    y = jnp.dot(pooled_ref[...], w_ref[...], preferred_element_type=jnp.float32)
    y = y + b_ref[...]
    mean = jnp.mean(y, axis=0, keepdims=True)
    var = jnp.mean(jnp.square(y - mean), axis=0, keepdims=True)   # biased, like PyTorch BN
    inv = jax.lax.rsqrt(var + 1e-5)
    o_ref[...] = (y - mean) * inv * gamma_ref[...] + beta_ref[...]


# ---------------------------------------------------------------------------
# Plain-JAX glue
# ---------------------------------------------------------------------------
def _round_up(x, m):
    return (x + m - 1) // m * m


def _pick_hw_tile(hw):
    for cand in (512, 256, 128, 64, 32, 16, 8):
        if hw % cand == 0:
            return cand
    return hw  # full extent is always a legal block size


def _im2col_3x3_same(x_nhwc):
    """3x3, stride 1, padding 1 patch extraction (layout glue)."""
    n, h, w, c = x_nhwc.shape
    xp = jnp.pad(x_nhwc, ((0, 0), (1, 1), (1, 1), (0, 0)))
    cols = [xp[:, dh:dh + h, dw:dw + w, :] for dh in range(3) for dw in range(3)]
    patches = jnp.concatenate(cols, axis=-1)                       # (N, H, W, 9*Cin)
    return patches.reshape(n, h * w, 9 * c)


def init_params(key, cin, feat_dim, embed_size):
    k_conv, k_fc = jax.random.split(key, 2)
    conv_w = jax.random.normal(k_conv, (3, 3, cin, feat_dim), jnp.float32) * 0.05
    conv_b = jnp.zeros((1, feat_dim), jnp.float32)
    # fc1: weight.normal_(0.0, 0.02); bias.fill_(0)
    fc_w = jax.random.normal(k_fc, (feat_dim, embed_size), jnp.float32) * 0.02
    fc_b = jnp.zeros((1, embed_size), jnp.float32)
    # BatchNorm1d defaults: weight=1, bias=0
    bn_gamma = jnp.ones((1, embed_size), jnp.float32)
    bn_beta = jnp.zeros((1, embed_size), jnp.float32)
    return dict(conv_w=conv_w, conv_b=conv_b, fc_w=fc_w, fc_b=fc_b,
                bn_gamma=bn_gamma, bn_beta=bn_beta)


def encoder_cnn_forward(images_nchw, params, *, tn=128):
    n, cin, h, w = images_nchw.shape
    hw = h * w
    feat_dim = params["conv_w"].shape[-1]
    embed_size = params["fc_w"].shape[-1]

    # -------- backbone: conv3x3(pad=1) + ReLU + global average pool --------
    x = jnp.transpose(images_nchw, (0, 2, 3, 1))                   # NCHW -> NHWC
    patches = _im2col_3x3_same(x).astype(jnp.bfloat16)             # (N, HW, K)
    k_dim = patches.shape[-1]

    feat_pad = _round_up(feat_dim, tn)
    conv_w2d = jnp.pad(params["conv_w"].reshape(k_dim, feat_dim),
                       ((0, 0), (0, feat_pad - feat_dim))).astype(jnp.bfloat16)
    conv_b = jnp.pad(params["conv_b"], ((0, 0), (0, feat_pad - feat_dim)))

    t_hw = _pick_hw_tile(hw)
    n_pad = max(8, _round_up(n, 8))                                # sublane-friendly pooled rows
    inv_hw = 1.0 / float(hw)

    pooled_pad = pl.pallas_call(
        functools.partial(conv_relu_pool_kernel, inv_hw=inv_hw),
        out_shape=jax.ShapeDtypeStruct((n_pad, feat_pad), jnp.float32),
        grid=(feat_pad // tn, n, hw // t_hw),
        in_specs=[
            pl.BlockSpec((1, t_hw, k_dim), lambda j, b, s: (b, s, 0)),   # patch tile
            pl.BlockSpec((k_dim, tn), lambda j, b, s: (0, j)),           # weight tile (resident per j)
            pl.BlockSpec((1, tn), lambda j, b, s: (0, j)),               # bias tile
        ],
        out_specs=pl.BlockSpec((n_pad, tn), lambda j, b, s: (0, j)),     # pooled accumulator
        scratch_shapes=[pltpu.VMEM((n_pad, tn), jnp.float32)],
        compiler_params=pltpu.CompilerParams(
            dimension_semantics=("parallel", "arbitrary", "arbitrary"),
            vmem_limit_bytes=32 * 1024 * 1024),
    )(patches, conv_w2d, conv_b)

    pooled = pooled_pad[:n, :feat_dim]                             # drop row/channel padding

    # -------- head: flatten -> fc1 -> BatchNorm1d (batch stats) --------
    e_pad = _round_up(embed_size, 128)                             # lane-dense output
    fc_w = jnp.pad(params["fc_w"], ((0, 0), (0, e_pad - embed_size)))
    fc_b = jnp.pad(params["fc_b"], ((0, 0), (0, e_pad - embed_size)))
    gamma = jnp.pad(params["bn_gamma"], ((0, 0), (0, e_pad - embed_size)),
                    constant_values=1.0)
    beta = jnp.pad(params["bn_beta"], ((0, 0), (0, e_pad - embed_size)))

    out_pad = pl.pallas_call(
        fc_bn_kernel,
        out_shape=jax.ShapeDtypeStruct((n, e_pad), jnp.float32),
        grid=(1,),
        in_specs=[
            pl.BlockSpec((n, feat_dim), lambda i: (0, 0)),
            pl.BlockSpec((feat_dim, e_pad), lambda i: (0, 0)),
            pl.BlockSpec((1, e_pad), lambda i: (0, 0)),
            pl.BlockSpec((1, e_pad), lambda i: (0, 0)),
            pl.BlockSpec((1, e_pad), lambda i: (0, 0)),
        ],
        out_specs=pl.BlockSpec((n, e_pad), lambda i: (0, 0)),
        compiler_params=pltpu.CompilerParams(
            dimension_semantics=("arbitrary",),
            vmem_limit_bytes=32 * 1024 * 1024),
    )(pooled, fc_w, fc_b, gamma, beta)

    return out_pad[:, :embed_size]


if __name__ == "__main__":
    key = jax.random.PRNGKey(0)
    k_img, k_params = jax.random.split(key)

    # Small shapes consistent with the module's forward (NCHW images like PyTorch):
    N, Cin, H, W = 2, 3, 16, 16
    FEAT_DIM = 256          # stand-in for resnet50.fc.in_features (=2048 in the real model)
    EMBED_SIZE = 32

    images = jax.random.normal(k_img, (N, Cin, H, W), jnp.float32)
    params = init_params(k_params, Cin, FEAT_DIM, EMBED_SIZE)

    features = encoder_cnn_forward(images, params)
    jax.block_until_ready(features)

    assert features.shape == (N, EMBED_SIZE)
    assert features.dtype == jnp.float32
    print("KERNEL_OK")
</pallas_src>

<mosaic_0001>
module attributes {stable_mosaic.version = 11 : i64} {
  func.func @conv_relu_pool_kernel(%arg0: i32, %arg1: i32, %arg2: i32, %arg3: memref<1x256x27xbf16, #tpu.memory_space<vmem>>, %arg4: memref<27x128xbf16, #tpu.memory_space<vmem>>, %arg5: memref<1x128xf32, #tpu.memory_space<vmem>>, %arg6: memref<8x128xf32, #tpu.memory_space<vmem>>, %arg7: memref<8x128xf32, #tpu.memory_space<vmem>>) attributes {dimension_semantics = [#tpu.dimension_semantics<parallel>, #tpu.dimension_semantics<arbitrary>, #tpu.dimension_semantics<arbitrary>], iteration_bounds = array<i64: 2, 2, 1>, scalar_prefetch = 0 : i64, scratch_operands = 1 : i64, tpu.core_type = #tpu.core_type<tc>, window_params = [{transform_indices = @transform_0, window_bounds = array<i64: 1, 256, 27>}, {transform_indices = @transform_1, window_bounds = array<i64: 27, 128>}, {transform_indices = @transform_2, window_bounds = array<i64: 1, 128>}, {transform_indices = @transform_3, window_bounds = array<i64: 8, 128>}]} {
    %c0_i32 = arith.constant 0 : i32
    %0 = arith.cmpi eq, %arg1, %c0_i32 : i32
    %c0_i32_0 = arith.constant 0 : i32
    %1 = arith.cmpi eq, %arg2, %c0_i32_0 : i32
    %2 = arith.andi %0, %1 : i1
    %3 = arith.extui %2 : i1 to i32
    %c0_i32_1 = arith.constant 0 : i32
    %4 = arith.cmpi ne, %3, %c0_i32_1 : i32
    scf.if %4 {
      %cst_17 = arith.constant 0.000000e+00 : f32
      %31 = vector.broadcast %cst_17 : f32 to vector<8x128xf32>
      %c0_18 = arith.constant 0 : index
      %c0_19 = arith.constant 0 : index
      %32 = vector.load %arg7[%c0_18, %c0_19] : memref<8x128xf32, #tpu.memory_space<vmem>>, vector<8x128xf32>
      tpu.vector_store %arg7[%c0_18, %c0_19], %31 {strides = array<i32>} : memref<8x128xf32, #tpu.memory_space<vmem>>, vector<8x128xf32>,
    } else {
    }
    %c0 = arith.constant 0 : index
    %c0_2 = arith.constant 0 : index
    %c0_3 = arith.constant 0 : index
    %5 = vector.load %arg3[%c0, %c0_2, %c0_3] : memref<1x256x27xbf16, #tpu.memory_space<vmem>>, vector<1x256x27xbf16>
    %6 = vector.shape_cast %5 : vector<1x256x27xbf16> to vector<256x27xbf16>
    %c0_4 = arith.constant 0 : index
    %c0_5 = arith.constant 0 : index
    %7 = vector.load %arg4[%c0_4, %c0_5] : memref<27x128xbf16, #tpu.memory_space<vmem>>, vector<27x128xbf16>
    %cst = arith.constant dense<0.000000e+00> : vector<256x128xf32>
    %8 = tpu.matmul %6, %7, %cst {dimension_numbers = #tpu.dot_dimension_numbers<[1], [0], [0], [1], [0, 0, 1, 1], [], []>} : vector<256x27xbf16>, vector<27x128xbf16>, vector<256x128xf32> -> vector<256x128xf32>
    %c0_6 = arith.constant 0 : index
    %c0_7 = arith.constant 0 : index
    %9 = vector.load %arg5[%c0_6, %c0_7] : memref<1x128xf32, #tpu.memory_space<vmem>>, vector<1x128xf32>
    %10 = vector.broadcast %9 : vector<1x128xf32> to vector<256x128xf32>
    %11 = arith.addf %8, %10 : vector<256x128xf32>
    %cst_8 = arith.constant 0.000000e+00 : f32
    %12 = vector.broadcast %cst_8 : f32 to vector<256x128xf32>
    %13 = arith.maximumf %11, %12 : vector<256x128xf32>
    %cst_9 = arith.constant dense<0.000000e+00> : vector<128xf32>
    %14 = vector.multi_reduction <add>, %13, %cst_9 [0] : vector<256x128xf32> to vector<128xf32>
    %15 = vector.shape_cast %14 : vector<128xf32> to vector<1x128xf32>
    %16 = tpu.iota {dimensions = array<i32: 0>} : vector<8x128xi32>
    %c0_10 = arith.constant 0 : index
    %c0_11 = arith.constant 0 : index
    %17 = vector.load %arg7[%c0_10, %c0_11] : memref<8x128xf32, #tpu.memory_space<vmem>>, vector<8x128xf32>
    %18 = vector.broadcast %arg1 : i32 to vector<8x128xi32>
    %19 = arith.cmpi eq, %16, %18 : vector<8x128xi32>
    %cst_12 = arith.constant 0.000000e+00 : f32
    %20 = vector.shape_cast %15 : vector<1x128xf32> to vector<1x128xf32>
    %21 = vector.broadcast %20 : vector<1x128xf32> to vector<8x128xf32>
    %22 = vector.broadcast %cst_12 : f32 to vector<8x128xf32>
    %23 = arith.select %19, %21, %22 : vector<8x128xi1>, vector<8x128xf32>
    %24 = arith.addf %17, %23 : vector<8x128xf32>
    %c0_13 = arith.constant 0 : index
    %c0_14 = arith.constant 0 : index
    %25 = vector.load %arg7[%c0_13, %c0_14] : memref<8x128xf32, #tpu.memory_space<vmem>>, vector<8x128xf32>
    tpu.vector_store %arg7[%c0_13, %c0_14], %24 {strides = array<i32>} : memref<8x128xf32, #tpu.memory_space<vmem>>, vector<8x128xf32>,
    %c1_i32 = arith.constant 1 : i32
    %26 = arith.cmpi eq, %arg1, %c1_i32 : i32
    %c0_i32_15 = arith.constant 0 : i32
    %27 = arith.cmpi eq, %arg2, %c0_i32_15 : i32
    %28 = arith.andi %26, %27 : i1
    %29 = arith.extui %28 : i1 to i32
    %c0_i32_16 = arith.constant 0 : i32
    %30 = arith.cmpi ne, %29, %c0_i32_16 : i32
    scf.if %30 {
      %c0_17 = arith.constant 0 : index
      %c0_18 = arith.constant 0 : index
      %31 = vector.load %arg7[%c0_17, %c0_18] : memref<8x128xf32, #tpu.memory_space<vmem>>, vector<8x128xf32>
      %cst_19 = arith.constant 3.906250e-03 : f32
      %32 = vector.broadcast %cst_19 : f32 to vector<8x128xf32>
      %33 = arith.mulf %31, %32 : vector<8x128xf32>
      %c0_20 = arith.constant 0 : index
      %c0_21 = arith.constant 0 : index
      %34 = vector.load %arg6[%c0_20, %c0_21] : memref<8x128xf32, #tpu.memory_space<vmem>>, vector<8x128xf32>
      tpu.vector_store %arg6[%c0_20, %c0_21], %33 {strides = array<i32>} : memref<8x128xf32, #tpu.memory_space<vmem>>, vector<8x128xf32>,
    } else {
    }
    return
  }
  func.func @transform_0(%arg0: i32, %arg1: i32, %arg2: i32) -> (i32, i32, i32) {
    %c0_i32 = arith.constant 0 : i32
    %c0_i32_0 = arith.constant 0 : i32
    return %arg1, %arg2, %c0_i32 : i32, i32, i32
  }
  func.func @transform_1(%arg0: i32, %arg1: i32, %arg2: i32) -> (i32, i32) {
    %c0_i32 = arith.constant 0 : i32
    %c0_i32_0 = arith.constant 0 : i32
    return %c0_i32, %arg0 : i32, i32
  }
  func.func @transform_2(%arg0: i32, %arg1: i32, %arg2: i32) -> (i32, i32) {
    %c0_i32 = arith.constant 0 : i32
    %c0_i32_0 = arith.constant 0 : i32
    return %c0_i32, %arg0 : i32, i32
  }
  func.func @transform_3(%arg0: i32, %arg1: i32, %arg2: i32) -> (i32, i32) {
    %c0_i32 = arith.constant 0 : i32
    %c0_i32_0 = arith.constant 0 : i32
    return %c0_i32, %arg0 : i32, i32
  }
}

</mosaic_0001>

<bundles_post_ra>
// kernel: tpu_custom_call.1
= control target key start
LH: loop header
LB: loop body
LE: loop exit
PB: predicated region body
PF: predicated region fallthrough
CT: control target
= control target key end

     0   :  { %8 = vsyncpa [#allocation5], 0  ;;  %s1417_s0 = inlined_call_operand.vmem [shape: bf16[2,256,27], index: 0, kind: input, shape index: {}]   ;;  %s1418_s1 = inlined_call_operand.vmem [shape: bf16[27,256], index: 1, kind: input, shape index: {}]   ;;  %s1419_s2 = inlined_call_operand.vmem [shape: f32[1,256], index: 2, kind: input, shape index: {}]   ;;  %s1420_s3 = inlined_call_operand.hbm [shape: f32[8,256], index: 3, kind: output, shape index: {}]  }
   0x1   :  { %10 = vsyncpa [#allocation5 + $0x1], 0  ;;  %s1178_s12 = smov 0   ;;  %s1180_s13 = smov 0  }
   0x2   :  { %s1182_s14 = smov 0   ;;  %s1184_s15 = smov 0  }
   0x3   :  { %s1186_s16 = smov 0   ;;  %s1188_s17 = smov 0  }
   0x4   :  { %s1190_s18 = smov 0   ;;  %s1192_s19 = smov 0  }
   0x5 LB: > { %s857_s20 = sadd.s32 4294967295, %s1153_s19   ;;  %s858_s21 = sadd.s32 4294967294, %s1153_s19   ;;  %s1153_s19 = sphi %s1192_s19, %s16_s19   ;;  %s1149_s18 = sphi %s1190_s18, %s1430_s18   ;;  %s1145_s17 = sphi %s1188_s17, %s1429_s17   ;;  %s1141_s16 = sphi %s1186_s16, %s1428_s16   ;;  %s1137_s15 = sphi %s1184_s15, %s1427_s15   ;;  %s1133_s14 = sphi %s1182_s14, %s1426_s14   ;;  %s1129_s13 = sphi %s1180_s13, %s1425_s13   ;;  %s1125_s12 = sphi %s1178_s12, %s1424_s12  }
   0x6   : > { %s31_s22 = sadd.s32 1, %s1145_s17  ;;  %s35_s23 = sadd.s32 1, %s1149_s18 }
   0x7   : > { %p33_p0 = scmp.ge.s32.totalorder %s31_s22, 2  ;;  %p77_p1 = scmp.ne.s32.totalorder %s1133_s14, %s1129_s13 }
   0x8   : > { %p78_p2 = scmp.eq.s32.totalorder %s1153_s19, 0  ;;  %p133_p4 = scmp.eq.s32.totalorder %s857_s20, 3 }
   0x9   : > { %s1432_s22 = smov (%p33_p0, %s31_s22), 0  ;;  %s1434_s23 = smov (!%p33_p0, %s35_s23), %s1149_s18 }
   0xa   : > { %p1228_p3 = por %p78_p2, %p77_p1  ;;  %p37_p5 = scmp.ge.s32.totalorder %s1434_s23, 2 }
   0xb   : > { %p138_p6 = scmp.ne.s32.totalorder %s1129_s13, %s1125_s12  ;;  %p1234_p7 = por %p133_p4, %p77_p1 }
   0xc   : > { %p139_p8 = scmp.eq.s32.totalorder %s858_s21, 3  ;;  %s1436_s23 = smov (%p37_p5, %s1434_s23), 0 }
   0xd   : > { %s67_s27 = ssub.s32 %s1149_s18, %s1436_s23  ;;  %s70_s28 = sadd.s32 1, %s1133_s14 }
   0xe   : > { %p1240_p9 = por %p139_p8, %p138_p6  ;;  %p68_p10 = scmp.eq.s32.totalorder %s67_s27, 0 }
   0xf   : > { %p860_p11 = scmp.ge.s32.totalorder %s1153_s19, 4 }
  0x10   : > { %s1248_s29 = scalar_select %p68_p10, %s1133_s14, %s70_s28  }
  0x11   : > { %155 = sbr.rel (%p860_p11) target bundleno = 28 (0x1c), region = 16 }
  0x16   : > { %171 = sbr.rel (!%p1228_p3) target bundleno = 28 (0x1c), region = 24  ;;  %s173_s30 = sand.u32 (%p1228_p3), 1, %s1133_s14  }
  0x17   : > { %s862_s4 = sshll.u32 (%p1228_p3), %s1149_s18, 2  ;;  %s861_s5 = sshll.u32 (%p1228_p3), %s173_s30, 4 }
  0x18   : > { %s177_s8 = scalar_lea.vmem (%p1228_p3), %s1418_s1, %s862_s4  ;;  %s175_s9 = scalar_lea.vmem (%p1228_p3), [#allocation3], %s861_s5 }
  0x19   : > { %v194_v0 = vld [vmem:[%s177_s8] sm:$0xf] (%p1228_p3)  ;;  %v196_v1 = vld [vmem:[%s177_s8 + $0x8] sm:$0xf] (%p1228_p3)  ;;  %v198_v2 = vld [vmem:[%s177_s8 + $0x10] sm:$0xf] (%p1228_p3) }
  0x1a   : > { %195 = vst [vmem:[%s175_s9] sm:$0xf] (%p1228_p3), %v194_v0  ;;  %197 = vst [vmem:[%s175_s9 + $0x4] sm:$0xf] (%p1228_p3), %v196_v1  ;;  %v200_v3 = vld [vmem:[%s177_s8 + $0x18] sm:$0xf] (%p1228_p3) }
  0x1b   : > { %199 = vst [vmem:[%s175_s9 + $0x8] sm:$0xf] %v198_v2  ;;  %201 = vst [vmem:[%s175_s9 + $0xc] sm:$0xf] %v200_v3 }
  0x1c PF: > { %p863_p12 = scmp.ge.s32.totalorder %s1153_s19, 1  ;;  %p238_p13 = scmp.lt.s32.totalorder %s1153_s19, 5 }
  0x1e   : > { %p239_p0 = pnand %p863_p12, %p238_p13 }
  0x1f   : > { %s1261_s10 = sand.u32 (!%p239_p0), 1, %s1129_s13   ;;  %p281_p1 = scmp.lt.s32.totalorder (!%p239_p0), %s1137_s15, 1 }
  0x20   : > { %242 = sbr.rel (%p239_p0) target bundleno = 371 (0x173), region = 69  ;;  %s864_s11 = sshll.u32 (!%p239_p0), %s1261_s10, 4 }
  0x21   : > { %s865_s20 = sshll.u32 (!%p239_p0), %s1261_s10, 3  ;;  %p290_p2 = scmp.lt.s32.totalorder (!%p239_p0), %s1141_s16, 1 }
  0x22   : > { %p294_p3 = scmp.eq.s32.totalorder (!%p239_p0), %s1137_s15, 0  ;;  %s247_s8 = scalar_lea.vmem (!%p239_p0), [#allocation3], %s864_s11 }
  0x23   : > { %s1281_s9 = scalar_lea.vmem (!%p239_p0), [#allocation4], %s865_s20 }
  0x25   : > { %s282_s21 = scalar_select %p281_p1, %s1137_s15, 1  ;;  %v1155_v4 = vmov (%p294_p3), 0.0  }
  0x26   : > { %s1275_s4 = scalar_select %p290_p2, %s1141_s16, 1  ;;  %300 = vst [vmem:[#allocation2] sm:$0xff] (%p294_p3), %v1155_v4 }
  0x27   : > { %s909_s24 = sshll.u32 %s282_s21, 7  ;;  %299 = sbr.rel (!%p294_p3) target bundleno = 44 (0x2c), region = 77 }
  0x28   : > { %s1272_s30 = scalar_lea.vmem %s1417_s0, %s909_s24  ;;  %s292_s7 = scalar_lea.vmem %s1419_s2, %s1275_s4 }
  0x2c PF: > { %v1043_v5 = vld [vmem:[%s247_s8 + $0x8] sm:$0x3f]   ;;  %vm484_vm0 = vcmask 1044480   ;;  %vm485_vm1 = vcmask 1045504   ;;  %v1156_v6 = vmov 65535   ;;  %vm435_vm2 = vcmask 220160  }
  0x2d   : > { %v486_v7 = vsel %vm484_vm0, 4294967295, %v1156_v6  ;;  %v1045_v8 = vld [vmem:[%s1272_s30] sm:$0xff]   ;;  %v1044_v11 = vld [vmem:[%s247_s8] sm:$0xff]   ;;  %v1047_v13 = vld [vmem:[%s1272_s30 + $0x10] sm:$0xff]   ;;  %p729_p4 = scmp.eq.s32.totalorder %s1137_s15, 1 }
  0x2e   : > { %v487_v9 = vsel %vm485_vm1, %v486_v7, 0  ;;  %934 = vmatprep.mubr.msk.bf16.mxu0 %vm435_vm2, %v1045_v8  ;;  %v1046_v12 = vld [vmem:[%s1272_s30 + $0x8] sm:$0xff]   ;;  %v1053_v14 = vld [vmem:[%s1272_s30 + $0x40] sm:$0xff]   ;;  %v1055_v16 = vld [vmem:[%s1272_s30 + $0x50] sm:$0xff]  }
  0x2f   : > { %v489_v10 = vand.u32 %v1043_v5, %v487_v9  ;;  %v1054_v15 = vld [vmem:[%s1272_s30 + $0x48] sm:$0xff]   ;;  %950 = vmatprep.mubr.msk.bf16.mxu1 %vm435_vm2, %v1053_v14  ;;  %v1048_v17 = vld [vmem:[%s1272_s30 + $0x18] sm:$0xff]   ;;  %v1049_v19 = vld [vmem:[%s1272_s30 + $0x20] sm:$0xff]  }
  0x30   : > { %v1056_v18 = vld [vmem:[%s1272_s30 + $0x58] sm:$0xff]   ;;  %v1057_v20 = vld [vmem:[%s1272_s30 + $0x60] sm:$0xff]   ;;  %v1050_v21 = vld [vmem:[%s1272_s30 + $0x28] sm:$0xff]  }
  0x31   : > { %930 = vmatprep.subr.bf16.mxu0 %v489_v10  ;;  %966 = vmatprep.subr.bf16.mxu1 %v489_v10  ;;  %v1058_v22 = vld [vmem:[%s1272_s30 + $0x68] sm:$0xff]   ;;  %v1051_v23 = vld [vmem:[%s1272_s30 + $0x30] sm:$0xff]   ;;  %v1052_v25 = vld [vmem:[%s1272_s30 + $0x38] sm:$0xff]  }
  0x32   : > { %931 = vmatpush3.bf16.msra.mxu0 %v489_v10  ;;  %968 = vmatpush3.bf16.msra.mxu1 %v489_v10  ;;  %v1059_v24 = vld [vmem:[%s1272_s30 + $0x70] sm:$0xff]   ;;  %v1060_v26 = vld [vmem:[%s1272_s30 + $0x78] sm:$0xff]   ;;  %v1325_v31 = vld [vmem:[%s292_s7] ss:$0 sm:$0xff] }
  0x33   : > { %932 = vmatprep.subr.bf16.mxu0 %v1044_v11  ;;  %967 = vmatprep.subr.bf16.mxu1 %v1044_v11 }
  0x36   : > { %933 = vmatpush3.bf16.msra.mxu0 %v1044_v11  ;;  %969 = vmatpush3.bf16.msra.mxu1 %v1044_v11 }
  0x39   : > { %935 = vmatmul.mubr.msk.bf16.vlgmr.msra.gmra.mxu0 %vm435_vm2, %v1046_v12  ;;  %951 = vmatmul.mubr.msk.bf16.vlgmr.msra.gmra.mxu1 %vm435_vm2, %v1054_v15 }
  0x3a   : > { %938 = vmatprep.mubr.msk.bf16.mxu0 %vm435_vm2, %v1047_v13  ;;  %954 = vmatprep.mubr.msk.bf16.mxu1 %vm435_vm2, %v1055_v16 }
  0x41   : > { %939 = vmatmul.mubr.msk.bf16.gmra.mxu0 %vm435_vm2, %v1048_v17  ;;  %955 = vmatmul.mubr.msk.bf16.gmra.mxu1 %vm435_vm2, %v1056_v18 }
  0x42   : > { %942 = vmatprep.mubr.msk.bf16.mxu0 %vm435_vm2, %v1049_v19  ;;  %958 = vmatprep.mubr.msk.bf16.mxu1 %vm435_vm2, %v1057_v20 }
  0x49   : > { %943 = vmatmul.mubr.msk.bf16.gmra.mxu0 %vm435_vm2, %v1050_v21  ;;  %959 = vmatmul.mubr.msk.bf16.gmra.mxu1 %vm435_vm2, %v1058_v22 }
  0x4a   : > { %946 = vmatprep.mubr.msk.bf16.mxu0 %vm435_vm2, %v1051_v23  ;;  %962 = vmatprep.mubr.msk.bf16.mxu1 %vm435_vm2, %v1059_v24 }
  0x51   : > { %947 = vmatmul.mubr.msk.bf16.gmra.mxu0 %vm435_vm2, %v1052_v25  ;;  %963 = vmatmul.mubr.msk.bf16.gmra.mxu1 %vm435_vm2, %v1060_v26 }
  0xf9   : > { %v936_v27 = vpop.f32.mrf.mxu0  ;;  %v1316_v28 = vpop.f32.mrf.mxu1 }
  0xfa   : > { %v534_v36 = vadd.f32 %v936_v27, %v1325_v31 }
  0xfb   : > { %v525_v29 = vpop.f32.mrf.mxu0  ;;  %v1318_v30 = vpop.f32.mrf.mxu1 }
  0xfc   : > { %v526_v33 = vadd.f32 %v1325_v31, %v525_v29  ;;  %v654_v44 = vmax.f32 %v534_v36, 0.0 }
  0xfd   : > { %v937_v32 = vpop.f32.mrf.mxu0  ;;  %v1328_v35 = vpop.f32.mrf.mxu1 }
  0xfe   : > { %v652_v39 = vmax.f32 %v526_v33, 0.0  ;;  %v537_v40 = vadd.f32 %v937_v32, %v1325_v31 }
  0xff   : > { %v528_v34 = vpop.f32.mrf.mxu0  ;;  %v592_v43 = vpop.f32.mrf.mxu1 }
 0x100   : > { %v529_v37 = vadd.f32 %v1325_v31, %v528_v34  ;;  %v655_v48 = vmax.f32 %v537_v40, 0.0 }
 0x101   : > { %v940_v38 = vpop.f32.mrf.mxu0  ;;  %v1334_v51 = vpop.f32.mrf.mxu1 }
 0x102   : > { %v653_v41 = vmax.f32 %v529_v37, 0.0  ;;  %v550_v52 = vadd.f32 %v940_v38, %v1325_v31  ;;  %v590_v37 = vadd.f32 %v1325_v31, %v1318_v30 }
 0x103   : > { %v541_v42 = vpop.f32.mrf.mxu0  ;;  %v605_v61 = vpop.f32.mrf.mxu1 }
 0x104   : > { %v684_v45 = vadd.f32 %v653_v41, %v652_v39  ;;  %v542_v46 = vadd.f32 %v1325_v31, %v541_v42  ;;  %v658_v62 = vmax.f32 %v550_v52, 0.0  ;;  %v593_v41 = vadd.f32 %v1325_v31, %v592_v43 }
 0x105   : > { %v941_v47 = vpop.f32.mrf.mxu0  ;;  %v957_v5 = vpop.f32.mrf.mxu1  ;;  %v606_v30 = vadd.f32 %v1325_v31, %v605_v61 }
 0x106   : > { %v685_v49 = vadd.f32 %v684_v45, %v654_v44  ;;  %v656_v53 = vmax.f32 %v542_v46, 0.0  ;;  %v553_v58 = vadd.f32 %v941_v47, %v1325_v31  ;;  %v598_v44 = vadd.f32 %v1316_v28, %v1325_v31 }
 0x107   : > { %v544_v50 = vpop.f32.mrf.mxu0  ;;  %v608_v15 = vpop.f32.mrf.mxu1  ;;  %v668_v45 = vmax.f32 %v590_v37, 0.0  ;;  %v601_v47 = vadd.f32 %v1328_v35, %v1325_v31  ;;  %v614_v28 = vadd.f32 %v1334_v51, %v1325_v31  ;;  %v617_v35 = vadd.f32 %v957_v5, %v1325_v31 }
 0x108   : > { %v686_v54 = vadd.f32 %v685_v49, %v655_v48  ;;  %v545_v55 = vadd.f32 %v1325_v31, %v544_v50  ;;  %v659_v2 = vmax.f32 %v553_v58, 0.0  ;;  %v669_v48 = vmax.f32 %v593_v41, 0.0  ;;  %v723_v41 = vld [vmem:[#allocation2] sm:$0xff] }
 0x109   : > { %v944_v56 = vpop.f32.mrf.mxu0  ;;  %v960_v23 = vpop.f32.mrf.mxu1  ;;  %v670_v52 = vmax.f32 %v598_v44, 0.0  ;;  %v609_v43 = vadd.f32 %v1325_v31, %v608_v15  ;;  %v675_v61 = vmax.f32 %v617_v35, 0.0 }
 0x10a   : > { %v687_v57 = vadd.f32 %v686_v54, %v656_v53  ;;  %v657_v59 = vmax.f32 %v545_v55, 0.0  ;;  %v566_v6 = vadd.f32 %v944_v56, %v1325_v31  ;;  %v671_v54 = vmax.f32 %v601_v47, 0.0 }
 0x10b   : > { %v557_v60 = vpop.f32.mrf.mxu0  ;;  %v621_v34 = vpop.f32.mrf.mxu1 }
 0x10c   : > { %v688_v63 = vadd.f32 %v687_v57, %v657_v59  ;;  %v558_v0 = vadd.f32 %v1325_v31, %v557_v60  ;;  %v662_v16 = vmax.f32 %v566_v6, 0.0  ;;  %v672_v57 = vmax.f32 %v606_v30, 0.0 }
 0x10d   : > { %v945_v1 = vpop.f32.mrf.mxu0  ;;  %v961_v42 = vpop.f32.mrf.mxu1  ;;  %v673_v60 = vmax.f32 %v609_v43, 0.0  ;;  %v630_v6 = vadd.f32 %v960_v23, %v1325_v31 }
 0x10e   : > { %v689_v3 = vadd.f32 %v688_v63, %v658_v62  ;;  %v660_v7 = vmax.f32 %v558_v0, 0.0  ;;  %v569_v12 = vadd.f32 %v945_v1, %v1325_v31  ;;  %v674_v63 = vmax.f32 %v614_v28, 0.0 }
 0x10f   : > { %v560_v4 = vpop.f32.mrf.mxu0  ;;  %v624_v50 = vpop.f32.mrf.mxu1  ;;  %v622_v1 = vadd.f32 %v1325_v31, %v621_v34 }
 0x110   : > { %v690_v8 = vadd.f32 %v689_v3, %v659_v2  ;;  %v561_v9 = vadd.f32 %v1325_v31, %v560_v4  ;;  %v663_v20 = vmax.f32 %v569_v12, 0.0  ;;  %v625_v3 = vadd.f32 %v1325_v31, %v624_v50 }
 0x111   : > { %v948_v10 = vpop.f32.mrf.mxu0  ;;  %v964_v56 = vpop.f32.mrf.mxu1 }
 0x112   : > { %v691_v11 = vadd.f32 %v690_v8, %v660_v7  ;;  %v661_v13 = vmax.f32 %v561_v9, 0.0  ;;  %v582_v24 = vadd.f32 %v948_v10, %v1325_v31  ;;  %v676_v7 = vmax.f32 %v622_v1, 0.0 }
 0x113   : > { %v573_v14 = vpop.f32.mrf.mxu0  ;;  %v637_v62 = vpop.f32.mrf.mxu1  ;;  %v633_v9 = vadd.f32 %v961_v42, %v1325_v31  ;;  %v677_v10 = vmax.f32 %v625_v3, 0.0 }
 0x114   : > { %v692_v17 = vadd.f32 %v691_v11, %v661_v13  ;;  %v574_v18 = vadd.f32 %v1325_v31, %v573_v14  ;;  %v666_v36 = vmax.f32 %v582_v24, 0.0  ;;  %v678_v11 = vmax.f32 %v630_v6, 0.0 }
 0x115   : > { %v949_v19 = vpop.f32.mrf.mxu0  ;;  %v965_v4 = vpop.f32.mrf.mxu1  ;;  %v638_v13 = vadd.f32 %v1325_v31, %v637_v62  ;;  %v679_v14 = vmax.f32 %v633_v9, 0.0 }
 0x116   : > { %v693_v21 = vadd.f32 %v692_v17, %v662_v16  ;;  %v664_v25 = vmax.f32 %v574_v18, 0.0  ;;  %v585_v32 = vadd.f32 %v949_v19, %v1325_v31  ;;  %v646_v17 = vadd.f32 %v964_v56, %v1325_v31 }
 0x117   : > { %v576_v22 = vpop.f32.mrf.mxu0  ;;  %v640_v5 = vpop.f32.mrf.mxu1  ;;  %v680_v18 = vmax.f32 %v638_v13, 0.0 }
 0x118   : > { %v694_v26 = vadd.f32 %v693_v21, %v663_v20  ;;  %v577_v27 = vadd.f32 %v1325_v31, %v576_v22  ;;  %v667_v39 = vmax.f32 %v585_v32, 0.0  ;;  %v641_v16 = vadd.f32 %v1325_v31, %v640_v5 }
 0x119   : > { %v649_v21 = vadd.f32 %v965_v4, %v1325_v31  ;;  %v682_v23 = vmax.f32 %v646_v17, 0.0  ;;  %v721_v32 = vlaneseq }
 0x11a   : > { %v695_v29 = vadd.f32 %v694_v26, %v664_v25  ;;  %v665_v33 = vmax.f32 %v577_v27, 0.0  ;;  %v681_v22 = vmax.f32 %v641_v16, 0.0 }
 0x11b   : > { %v683_v25 = vmax.f32 %v649_v21, 0.0 }
 0x11c   : > { %v696_v38 = vadd.f32 %v695_v29, %v665_v33 }
 0x11e   : > { %v697_v40 = vadd.f32 %v696_v38, %v666_v36  ;;  %v722_v36 = vshrl.u32 %v721_v32, 7  ;;  %v724_v38 = vstv %s1137_s15 }
 0x120   : > { %v698_v46 = vadd.f32 %v697_v40, %v667_v39  ;;  %vm725_vm3 = vcmp.eq.s32.totalorder %v722_v36, %v724_v38 }
 0x122   : > { %v699_v49 = vadd.f32 %v698_v46, %v668_v45 }
 0x124   : > { %v700_v53 = vadd.f32 %v699_v49, %v669_v48 }
 0x126   : > { %v701_v55 = vadd.f32 %v700_v53, %v670_v52 }
 0x128   : > { %v702_v58 = vadd.f32 %v701_v55, %v671_v54 }
 0x12a   : > { %v703_v59 = vadd.f32 %v702_v58, %v672_v57 }
 0x12c   : > { %v704_v0 = vadd.f32 %v703_v59, %v673_v60 }
 0x12e   : > { %v705_v2 = vadd.f32 %v704_v0, %v674_v63 }
 0x130   : > { %v706_v51 = vadd.f32 %v705_v2, %v675_v61 }
 0x132   : > { %v707_v8 = vadd.f32 %v706_v51, %v676_v7 }
 0x134   : > { %v708_v12 = vadd.f32 %v707_v8, %v677_v10 }
 0x136   : > { %v709_v15 = vadd.f32 %v708_v12, %v678_v11 }
 0x138   : > { %v710_v19 = vadd.f32 %v709_v15, %v679_v14 }
 0x13a   : > { %v711_v20 = vadd.f32 %v710_v19, %v680_v18 }
 0x13c   : > { %v712_v24 = vadd.f32 %v711_v20, %v681_v22 }
 0x13e   : > { %v713_v26 = vadd.f32 %v712_v24, %v682_v23 }
 0x140   : > { %v714_v27 = vadd.f32 %v713_v26, %v683_v25 }
 0x142   : > { %v715_v29 = vrot.slane %v714_v27, 4 }
 0x144   : > { %v716_v33 = vadd.f32 %v715_v29, %v714_v27 }
 0x146   : > { %v717_v34 = vrot.slane %v716_v33, 2 }
 0x148   : > { %v718_v37 = vadd.f32 %v717_v34, %v716_v33 }
 0x14a   : > { %v719_v39 = vrot.slane %v718_v37, 1 }
 0x14c   : > { %v720_v40 = vadd.f32 %v719_v39, %v718_v37 }
 0x14d   : > { %733 = sbr.rel (!%p729_p4) target bundleno = 348 (0x15c), region = 81 }
 0x14e   : > { %v726_v42 = vsel %vm725_vm3, %v720_v40, 0.0 }
 0x14f   : > { %v727_v44 = vadd.f32 %v726_v42, %v723_v41 }
 0x151   : > { %728 = vst [vmem:[#allocation2] sm:$0xff] %v727_v44 }
 0x158   : > { %v734_v31 = vld [vmem:[#allocation2] sm:$0xff] }
 0x159   : > { %v735_v45 = vmul.f32 0.00390625, %v734_v31 }
 0x15b   : > { %736 = vst [vmem:[%s1281_s9] sm:$0xff] %v735_v45 }
 0x15c PF: > { %s906_s21 = sshll.u32 %s1141_s16, 7  ;;  %s751_s30 = sshll.u32 %s1281_s9, 4  ;;  %s752_s30 = int_to_ptr.vmem [resolvable:$true] %s751_s30 }
 0x15d   : > { %s749_s28 = scalar_lea.hbm %s1420_s3, %s906_s21  ;;  %s738_s4 = scalar_lea.sflag [#allocation5], %s1261_s10 }
 0x15e   : > { %s1061_s5 = scalar_lea.vmem %s752_s30, 128  ;;  %s1157_s15 = smov [#allocation4]  }
 0x15f   : > { %p1062_p5 = scmp.ne.s32.totalorder %s752_s30, %s1061_s5  ;;  %s1065_s6 = sshll.u32 %s1157_s15, 4  ;;  %s1066_s6 = int_to_ptr.vmem [resolvable:$false] %s1065_s6 }
 0x160   : > { %s1067_s7 = scalar_lea.vmem %s1066_s6, 256  ;;  %p1068_p10 = scmp.lt.s32.totalorder %s752_s30, %s1066_s6 }
 0x161   : > { %p1063_p6 = pnand %p1062_p5, %p1234_p7  ;;  %p1069_p11 = scmp.lt.s32.totalorder %s1067_s7, %s1061_s5 }
 0x163   : > { %p1064_p8 = pneg %p1063_p6  ;;  %p1070_p12 = por %p1069_p11, %p1068_p10 }
 0x165   : > { %p1071_p13 = pnand %p1070_p12, %p1064_p8 }
 0x167   : > { %1074 = shalt.err (!%p1071_p13)
}
 0x168   : > { %s1075_s16 = scalar_lea.hbm %s749_s28, 128  ;;  %s1079_s9 = scalar_lea.hbm %s1420_s3, 256 }
 0x169   : > { %p1076_p0 = scmp.ne.s32.totalorder %s749_s28, %s1075_s16  ;;  %p1080_p3 = scmp.lt.s32.totalorder %s749_s28, %s1420_s3 }
 0x16a   : > { %p1081_p4 = scmp.lt.s32.totalorder %s1079_s9, %s1075_s16 }
 0x16b   : > { %p1077_p1 = pnand %p1076_p0, %p1234_p7 }
 0x16c   : > { %p1082_p5 = por %p1081_p4, %p1080_p3 }
 0x16d   : > { %p1078_p2 = pneg %p1077_p1 }
 0x16f   : > { %p1083_p6 = pnand %p1082_p5, %p1078_p2 }
 0x171   : > { %1086 = shalt.err (!%p1083_p6)
}
 0x172   : > { %970 = dma.vmem_to_hbm [thread:$0]  (%p1234_p7), %s752_s30, 128, %s749_s28, %s738_s4  }
 0x173 PF: > { %p976_p8 = scmp.ge.s32.totalorder %s1153_s19, 2  ;;  %s763_s21 = sand.u32 1, %s1125_s12  }
 0x174   : > { %s764_s24 = scalar_lea.sflag [#allocation5], %s763_s21 }
 0x175   : > { %p973_p10 = pnand %p976_p8, %p1240_p9 }
 0x177   : > { %p974_p11 = pneg %p973_p10 }
 0x179   : > { %1120 = dma.done.wait (%p974_p11), %s764_s24, 128  }
 0x17a   : > { %1122 = vsyncadd (%p974_p11), %s764_s24, 4294967168  ;;  %s16_s19 = sadd.s32 1, %s1153_s19   ;;  %s1424_s12 = smov %s1129_s13 }
 0x17b   : > { %p13_p12 = scmp.ge.s32.totalorder %s16_s19, 6   ;;  %s1425_s13 = smov %s1133_s14 }
 0x17c   : > { %s1426_s14 = smov %s1248_s29  ;;  %s1427_s15 = smov %s1145_s17 }
 0x17d   : > { %s1428_s16 = smov %s1149_s18  ;;  %s1429_s17 = smov %s1432_s22 }
 0x17e   : > { %s1430_s18 = smov %s1436_s23  ;;  %15 = sbr.rel (!%p13_p12) target bundleno = 5 (0x5), region = 127 }
 0x183   :  { %769 = vsyncpa [#allocation5], 1 }
 0x184   :  { %771 = vsyncpa [#allocation5 + $0x1], 1 }

</bundles_post_ra>
